<compile_context>
chip_gen: v6e
topology: v6e:2x2x1
jax: 0.10.0
libtpu: 0.0.40
codegen_flags: <defaults>
</compile_context>

<pallas_src>
import functools

import numpy as np

import jax
import jax.numpy as jnp
from jax import lax
from jax.experimental import pallas as pl
from jax.experimental.pallas import tpu as pltpu


def _channel_select_kernel(x_ref, y_ref, par_ref, g_ref, gt_ref, oneh_ref,
                           o_ref, *, inv_hw):
    # x_ref, y_ref : (BR, HWp)   BR = nb*C rows (image-major), lane-dense HWp
    # par_ref      : (4C+6, C)   [Wxx^T; Wyx^T; Wxy^T; Wyy^T; wdw_x; wdw_y;
    #                             bdw_x; bdw_y; bp_x; bp_y]
    # g_ref        : (nb, BR)    0/1,  g[n, r] = (r // C == n)
    # gt_ref       : (BR, nb)    g transposed
    # oneh_ref     : (BR, C)     0/1,  oneh[r, c] = (r % C == c)
    # o_ref        : (BR, HWp)
    BR, _ = x_ref.shape
    nb = g_ref.shape[0]
    C = oneh_ref.shape[1]
    f32 = jnp.float32

    # ---- AdaptiveAvgPool2d(1): per-row lane reduction (f32 accumulation). --
    # Zero lane-padding does not change the sums; inv_hw uses the true H*W.
    sx = jnp.sum(x_ref[...].astype(f32), axis=1, keepdims=True) * inv_hw  # (BR,1)
    sy = jnp.sum(y_ref[...].astype(f32), axis=1, keepdims=True) * inv_hw  # (BR,1)

    g = g_ref[...]                                   # (nb, BR)
    oneh = oneh_ref[...]                             # (BR, C)

    # Bridge column (row n*C+c) -> matrix (n, c): exact 0/1 selection matmul.
    Sx = jnp.dot(g, sx * oneh, preferred_element_type=f32)   # (nb, C)
    Sy = jnp.dot(g, sy * oneh, preferred_element_type=f32)   # (nb, C)

    # ---- depthwise 1x1 conv (groups == channels): per-channel scale+bias ---
    wdx = par_ref[4 * C + 0:4 * C + 1, :]            # (1, C)
    wdy = par_ref[4 * C + 1:4 * C + 2, :]
    bdx = par_ref[4 * C + 2:4 * C + 3, :]
    bdy = par_ref[4 * C + 3:4 * C + 4, :]
    bpx = par_ref[4 * C + 4:4 * C + 5, :]
    bpy = par_ref[4 * C + 5:4 * C + 6, :]
    Dx = Sx * wdx + bdx                              # (nb, C)
    Dy = Sy * wdy + bdy                              # (nb, C)

    # ---- pointwise 1x1 conv: Z = D @ W^T, split into x/y halves ------------
    a_xx = par_ref[0 * C:1 * C, :]                   # (C, C) = W[:C,:C]^T
    a_yx = par_ref[1 * C:2 * C, :]                   # (C, C) = W[:C,C:]^T
    a_xy = par_ref[2 * C:3 * C, :]                   # (C, C) = W[C:,:C]^T
    a_yy = par_ref[3 * C:4 * C, :]                   # (C, C) = W[C:,C:]^T
    Zx = (jnp.dot(Dx, a_xx, preferred_element_type=f32)
          + jnp.dot(Dy, a_yx, preferred_element_type=f32) + bpx)   # (nb, C)
    Zy = (jnp.dot(Dx, a_xy, preferred_element_type=f32)
          + jnp.dot(Dy, a_yy, preferred_element_type=f32) + bpy)   # (nb, C)

    # ---- sigmoid(softmax(z, dim=channel)) over the 2C channels per image ---
    m = jnp.maximum(jnp.max(Zx, axis=1, keepdims=True),
                    jnp.max(Zy, axis=1, keepdims=True))             # (nb, 1)
    ex = jnp.exp(Zx - m)
    ey = jnp.exp(Zy - m)
    s_inv = pl.reciprocal(jnp.sum(ex, axis=1, keepdims=True)
                          + jnp.sum(ey, axis=1, keepdims=True), approx=True)
    cax = 1.0 / (1.0 + jnp.exp(-(ex * s_inv)))                      # (nb, C)
    cay = 1.0 / (1.0 + jnp.exp(-(ey * s_inv)))                      # (nb, C)

    # alpha in {0, 0.5, 1}:  out = alpha*x + (1-alpha)*y  (matches the module)
    alpha = jnp.where(cax > cay, jnp.float32(1.0),
                      jnp.where(cax < cay, jnp.float32(0.0), jnp.float32(0.5)))

    # Bridge matrix (n, c) -> column (row n*C+c): exact 0/1 selection.
    acol = jnp.sum(jnp.dot(gt_ref[...], alpha, preferred_element_type=f32)
                   * oneh, axis=1, keepdims=True)                   # (BR, 1)

    # ---- blend in the input dtype, written straight to the output ----------
    a = acol.astype(o_ref.dtype)
    o_ref[...] = a * x_ref[...] + (1 - a) * y_ref[...]


def _choose_images_per_block(N, C, HWp, itemsize):
    """Images per grid step: fill all 8 sublanes (nb*C % 8 == 0) when possible,
    keep the block <= ~2 MiB (fits double-buffered in VMEM on v5e/v6e/v7x),
    and keep >= ~8 grid steps for large batches (2 TCs x >= 4 steps)."""
    bytes_per_image = max(1, C * HWp * itemsize)
    nb_vmem = max(1, (2 * 1024 * 1024) // bytes_per_image)
    sub_fill = max(1, -(-8 // C))                    # ceil(8 / C)
    target = max(1, min(max(sub_fill, N // 8), nb_vmem, N))
    divisors = [d for d in range(1, N + 1) if N % d == 0]
    full = [d for d in divisors if (d * C) % 8 == 0]
    for cand in (
        [d for d in full if d <= target],            # full sublanes, ideal grid
        [d for d in full if d <= nb_vmem],           # full sublanes, fits VMEM
        ([N] if N <= nb_vmem else []),               # whole batch (block==array)
        [d for d in divisors if d <= target],
    ):
        if cand:
            return max(cand)
    return 1


def channel_select(x, y, w_dw, b_dw, w_pw, b_pw):
    """ChannelSelect forward.
       x, y : (N, C, H, W);  w_dw: (2C, 1, 1, 1);  b_dw: (2C,);
       w_pw : (2C, 2C, 1, 1);  b_pw: (2C,).  Returns (N, C, H, W)."""
    N, C, H, W = x.shape
    C2 = 2 * C
    HW = H * W
    HWp = max(128, ((HW + 127) // 128) * 128)        # lane-dense output store
    itemsize = x.dtype.itemsize

    nb = _choose_images_per_block(N, C, HWp, itemsize)
    BR = nb * C
    grid_len = N // nb

    # Free, layout-preserving reshape: (N, C, H, W) -> (N*C, HW).
    x2d = x.reshape(N * C, HW)
    y2d = y.reshape(N * C, HW)
    if HWp != HW:
        pad = ((0, 0), (0, HWp - HW))
        x2d = jnp.pad(x2d, pad)
        y2d = jnp.pad(y2d, pad)

    # ---- one-time (trace-time) parameter packing into a single array -------
    f32 = jnp.float32
    Wm = w_pw[:, :, 0, 0].astype(f32)                # (2C, 2C) (out, in)
    wdw = w_dw.reshape(C2).astype(f32)
    bdw = b_dw.astype(f32)
    bp = b_pw.astype(f32)
    par = jnp.concatenate(
        [Wm[:C, :C].T, Wm[:C, C:].T, Wm[C:, :C].T, Wm[C:, C:].T,
         wdw[:C][None, :], wdw[C:][None, :],
         bdw[:C][None, :], bdw[C:][None, :],
         bp[:C][None, :], bp[C:][None, :]], axis=0)  # (4C + 6, C)

    # ---- 0/1 bridge masks between row index n*C+c and (n, c) ---------------
    rows = np.arange(BR)
    g_np = (rows[None, :] // C == np.arange(nb)[:, None]).astype(np.float32)
    gt_np = np.ascontiguousarray(g_np.T)
    oneh_np = (rows[:, None] % C == np.arange(C)[None, :]).astype(np.float32)
    g = jnp.asarray(g_np)
    gt = jnp.asarray(gt_np)
    oneh = jnp.asarray(oneh_np)

    # VMEM budget: double-buffered x, y, out blocks + small params + slack.
    # Capped at 56 MiB so the same tiling also compiles on v7x (64 MiB VMEM).
    block_bytes = BR * HWp * itemsize
    vmem_limit = int(min(max(6 * block_bytes + (2 << 20), 16 << 20), 56 << 20))

    cost = pl.CostEstimate(
        flops=int(5 * N * C * HWp),
        transcendentals=int(8 * N * C),
        bytes_accessed=int(3 * N * C * HWp * itemsize))

    kernel = functools.partial(_channel_select_kernel, inv_hw=1.0 / float(HW))

    out2d = pl.pallas_call(
        kernel,
        out_shape=jax.ShapeDtypeStruct((N * C, HWp), x.dtype),
        grid=(grid_len,),
        in_specs=[
            pl.BlockSpec((BR, HWp), lambda i: (i, 0)),       # x
            pl.BlockSpec((BR, HWp), lambda i: (i, 0)),       # y
            pl.BlockSpec((4 * C + 6, C), lambda i: (0, 0)),  # packed params
            pl.BlockSpec((nb, BR), lambda i: (0, 0)),        # g
            pl.BlockSpec((BR, nb), lambda i: (0, 0)),        # g^T
            pl.BlockSpec((BR, C), lambda i: (0, 0)),         # one-hot (r%C)
        ],
        out_specs=pl.BlockSpec((BR, HWp), lambda i: (i, 0)),
        compiler_params=pltpu.CompilerParams(
            dimension_semantics=("parallel",),
            vmem_limit_bytes=vmem_limit),
        cost_estimate=cost,
    )(x2d, y2d, par, g, gt, oneh)

    if HWp != HW:
        out2d = out2d[:, :HW]
    return out2d.reshape(N, C, H, W)


def _reference(x, y, w_dw, b_dw, w_pw, b_pw):
    N, C, H, W = x.shape
    C2 = 2 * C
    xy = jnp.concatenate([x, y], axis=1)                    # (N, 2C, H, W)
    pooled = jnp.mean(xy, axis=(2, 3), keepdims=True)       # (N, 2C, 1, 1)
    dn = ("NCHW", "OIHW", "NCHW")
    dw = lax.conv_general_dilated(pooled, w_dw, (1, 1), "SAME",
                                  feature_group_count=C2, dimension_numbers=dn)
    dw = dw + b_dw[None, :, None, None]
    pw = lax.conv_general_dilated(dw, w_pw, (1, 1), "VALID",
                                  dimension_numbers=dn)
    pw = pw + b_pw[None, :, None, None]
    ca = jax.nn.sigmoid(jax.nn.softmax(pw, axis=1))         # (N, 2C, 1, 1)
    cax, cay = ca[:, :C], ca[:, C:]
    m1 = (cax > cay).astype(x.dtype)
    m2 = (cax < cay).astype(x.dtype)
    me = (cax == cay).astype(x.dtype)
    return m1 * x + m2 * y + me * (x + y) / 2


if __name__ == "__main__":
    N, in_planes, H, W = 2, 4, 16, 16
    C2 = 2 * in_planes

    key = jax.random.PRNGKey(0)
    kx, ky, k1, k2, k3, k4 = jax.random.split(key, 6)

    x = jax.random.normal(kx, (N, in_planes, H, W), dtype=jnp.float32)
    y = jax.random.normal(ky, (N, in_planes, H, W), dtype=jnp.float32)
    # depth_conv: Conv2d(2C, 2C, 1, groups=2C) -> weight (2C, 1, 1, 1), bias (2C,)
    w_dw = jax.random.normal(k1, (C2, 1, 1, 1), dtype=jnp.float32) * 0.5
    b_dw = jax.random.normal(k2, (C2,), dtype=jnp.float32) * 0.5
    # point_conv: Conv2d(2C, 2C, 1) -> weight (2C, 2C, 1, 1), bias (2C,)
    w_pw = jax.random.normal(k3, (C2, C2, 1, 1), dtype=jnp.float32) * 0.5
    b_pw = jax.random.normal(k4, (C2,), dtype=jnp.float32) * 0.5

    out = channel_select(x, y, w_dw, b_dw, w_pw, b_pw)
    out = jax.block_until_ready(out)

    ref = _reference(x, y, w_dw, b_dw, w_pw, b_pw)
    assert out.shape == (N, in_planes, H, W)
    assert jnp.allclose(out, ref, atol=1e-4, rtol=1e-4), "mismatch vs lax reference"

    print("KERNEL_OK")
</pallas_src>

<mosaic_0001>
module attributes {stable_mosaic.version = 11 : i64} {
  func.func @_channel_select_kernel(%arg0: i32, %arg1: memref<8x256xf32, #tpu.memory_space<vmem>>, %arg2: memref<8x256xf32, #tpu.memory_space<vmem>>, %arg3: memref<22x4xf32, #tpu.memory_space<vmem>>, %arg4: memref<2x8xf32, #tpu.memory_space<vmem>>, %arg5: memref<8x2xf32, #tpu.memory_space<vmem>>, %arg6: memref<8x4xf32, #tpu.memory_space<vmem>>, %arg7: memref<8x256xf32, #tpu.memory_space<vmem>>) attributes {dimension_semantics = [#tpu.dimension_semantics<parallel>], iteration_bounds = array<i64: 1>, scalar_prefetch = 0 : i64, scratch_operands = 0 : i64, tpu.core_type = #tpu.core_type<tc>, window_params = [{transform_indices = @transform_0, window_bounds = array<i64: 8, 256>}, {transform_indices = @transform_1, window_bounds = array<i64: 8, 256>}, {pipeline_mode = #tpu.pipeline_mode<synchronous>, transform_indices = @transform_2, window_bounds = array<i64: 22, 4>}, {pipeline_mode = #tpu.pipeline_mode<synchronous>, transform_indices = @transform_3, window_bounds = array<i64: 2, 8>}, {pipeline_mode = #tpu.pipeline_mode<synchronous>, transform_indices = @transform_4, window_bounds = array<i64: 8, 2>}, {pipeline_mode = #tpu.pipeline_mode<synchronous>, transform_indices = @transform_5, window_bounds = array<i64: 8, 4>}, {transform_indices = @transform_6, window_bounds = array<i64: 8, 256>}]} {
    %c0 = arith.constant 0 : index
    %c0_0 = arith.constant 0 : index
    %0 = vector.load %arg1[%c0, %c0_0] : memref<8x256xf32, #tpu.memory_space<vmem>>, vector<8x256xf32>
    %cst = arith.constant dense<0.000000e+00> : vector<8xf32>
    %1 = vector.multi_reduction <add>, %0, %cst [1] : vector<8x256xf32> to vector<8xf32>
    %2 = vector.shape_cast %1 : vector<8xf32> to vector<8x1xf32>
    %cst_1 = arith.constant 3.906250e-03 : f32
    %3 = vector.broadcast %cst_1 : f32 to vector<8x1xf32>
    %4 = arith.mulf %2, %3 : vector<8x1xf32>
    %c0_2 = arith.constant 0 : index
    %c0_3 = arith.constant 0 : index
    %5 = vector.load %arg2[%c0_2, %c0_3] : memref<8x256xf32, #tpu.memory_space<vmem>>, vector<8x256xf32>
    %cst_4 = arith.constant dense<0.000000e+00> : vector<8xf32>
    %6 = vector.multi_reduction <add>, %5, %cst_4 [1] : vector<8x256xf32> to vector<8xf32>
    %7 = vector.shape_cast %6 : vector<8xf32> to vector<8x1xf32>
    %cst_5 = arith.constant 3.906250e-03 : f32
    %8 = vector.broadcast %cst_5 : f32 to vector<8x1xf32>
    %9 = arith.mulf %7, %8 : vector<8x1xf32>
    %c0_6 = arith.constant 0 : index
    %c0_7 = arith.constant 0 : index
    %10 = vector.load %arg4[%c0_6, %c0_7] : memref<2x8xf32, #tpu.memory_space<vmem>>, vector<2x8xf32>
    %c0_8 = arith.constant 0 : index
    %c0_9 = arith.constant 0 : index
    %11 = vector.load %arg6[%c0_8, %c0_9] : memref<8x4xf32, #tpu.memory_space<vmem>>, vector<8x4xf32>
    %12 = vector.broadcast %4 : vector<8x1xf32> to vector<8x4xf32>
    %13 = arith.mulf %12, %11 : vector<8x4xf32>
    %cst_10 = arith.constant dense<0.000000e+00> : vector<2x4xf32>
    %14 = tpu.matmul %10, %13, %cst_10 {dimension_numbers = #tpu.dot_dimension_numbers<[1], [0], [0], [1], [0, 0, 1, 1], [], []>} : vector<2x8xf32>, vector<8x4xf32>, vector<2x4xf32> -> vector<2x4xf32>
    %15 = vector.broadcast %9 : vector<8x1xf32> to vector<8x4xf32>
    %16 = arith.mulf %15, %11 : vector<8x4xf32>
    %cst_11 = arith.constant dense<0.000000e+00> : vector<2x4xf32>
    %17 = tpu.matmul %10, %16, %cst_11 {dimension_numbers = #tpu.dot_dimension_numbers<[1], [0], [0], [1], [0, 0, 1, 1], [], []>} : vector<2x8xf32>, vector<8x4xf32>, vector<2x4xf32> -> vector<2x4xf32>
    %c16 = arith.constant 16 : index
    %c0_12 = arith.constant 0 : index
    %18 = vector.load %arg3[%c16, %c0_12] : memref<22x4xf32, #tpu.memory_space<vmem>>, vector<1x4xf32>
    %c17 = arith.constant 17 : index
    %c0_13 = arith.constant 0 : index
    %19 = vector.load %arg3[%c17, %c0_13] : memref<22x4xf32, #tpu.memory_space<vmem>>, vector<1x4xf32>
    %c18 = arith.constant 18 : index
    %c0_14 = arith.constant 0 : index
    %20 = vector.load %arg3[%c18, %c0_14] : memref<22x4xf32, #tpu.memory_space<vmem>>, vector<1x4xf32>
    %c19 = arith.constant 19 : index
    %c0_15 = arith.constant 0 : index
    %21 = vector.load %arg3[%c19, %c0_15] : memref<22x4xf32, #tpu.memory_space<vmem>>, vector<1x4xf32>
    %c20 = arith.constant 20 : index
    %c0_16 = arith.constant 0 : index
    %22 = vector.load %arg3[%c20, %c0_16] : memref<22x4xf32, #tpu.memory_space<vmem>>, vector<1x4xf32>
    %c21 = arith.constant 21 : index
    %c0_17 = arith.constant 0 : index
    %23 = vector.load %arg3[%c21, %c0_17] : memref<22x4xf32, #tpu.memory_space<vmem>>, vector<1x4xf32>
    %24 = vector.broadcast %18 : vector<1x4xf32> to vector<2x4xf32>
    %25 = arith.mulf %14, %24 : vector<2x4xf32>
    %26 = vector.broadcast %20 : vector<1x4xf32> to vector<2x4xf32>
    %27 = arith.addf %25, %26 : vector<2x4xf32>
    %28 = vector.broadcast %19 : vector<1x4xf32> to vector<2x4xf32>
    %29 = arith.mulf %17, %28 : vector<2x4xf32>
    %30 = vector.broadcast %21 : vector<1x4xf32> to vector<2x4xf32>
    %31 = arith.addf %29, %30 : vector<2x4xf32>
    %c0_18 = arith.constant 0 : index
    %c0_19 = arith.constant 0 : index
    %32 = vector.load %arg3[%c0_18, %c0_19] : memref<22x4xf32, #tpu.memory_space<vmem>>, vector<4x4xf32>
    %c4 = arith.constant 4 : index
    %c0_20 = arith.constant 0 : index
    %33 = vector.load %arg3[%c4, %c0_20] : memref<22x4xf32, #tpu.memory_space<vmem>>, vector<4x4xf32>
    %c8 = arith.constant 8 : index
    %c0_21 = arith.constant 0 : index
    %34 = vector.load %arg3[%c8, %c0_21] : memref<22x4xf32, #tpu.memory_space<vmem>>, vector<4x4xf32>
    %c12 = arith.constant 12 : index
    %c0_22 = arith.constant 0 : index
    %35 = vector.load %arg3[%c12, %c0_22] : memref<22x4xf32, #tpu.memory_space<vmem>>, vector<4x4xf32>
    %cst_23 = arith.constant dense<0.000000e+00> : vector<2x4xf32>
    %36 = tpu.matmul %27, %32, %cst_23 {dimension_numbers = #tpu.dot_dimension_numbers<[1], [0], [0], [1], [0, 0, 1, 1], [], []>} : vector<2x4xf32>, vector<4x4xf32>, vector<2x4xf32> -> vector<2x4xf32>
    %cst_24 = arith.constant dense<0.000000e+00> : vector<2x4xf32>
    %37 = tpu.matmul %31, %33, %cst_24 {dimension_numbers = #tpu.dot_dimension_numbers<[1], [0], [0], [1], [0, 0, 1, 1], [], []>} : vector<2x4xf32>, vector<4x4xf32>, vector<2x4xf32> -> vector<2x4xf32>
    %38 = arith.addf %36, %37 : vector<2x4xf32>
    %39 = vector.broadcast %22 : vector<1x4xf32> to vector<2x4xf32>
    %40 = arith.addf %38, %39 : vector<2x4xf32>
    %cst_25 = arith.constant dense<0.000000e+00> : vector<2x4xf32>
    %41 = tpu.matmul %27, %34, %cst_25 {dimension_numbers = #tpu.dot_dimension_numbers<[1], [0], [0], [1], [0, 0, 1, 1], [], []>} : vector<2x4xf32>, vector<4x4xf32>, vector<2x4xf32> -> vector<2x4xf32>
    %cst_26 = arith.constant dense<0.000000e+00> : vector<2x4xf32>
    %42 = tpu.matmul %31, %35, %cst_26 {dimension_numbers = #tpu.dot_dimension_numbers<[1], [0], [0], [1], [0, 0, 1, 1], [], []>} : vector<2x4xf32>, vector<4x4xf32>, vector<2x4xf32> -> vector<2x4xf32>
    %43 = arith.addf %41, %42 : vector<2x4xf32>
    %44 = vector.broadcast %23 : vector<1x4xf32> to vector<2x4xf32>
    %45 = arith.addf %43, %44 : vector<2x4xf32>
    %cst_27 = arith.constant dense<0xFF800000> : vector<2xf32>
    %46 = vector.multi_reduction <maximumf>, %40, %cst_27 [1] : vector<2x4xf32> to vector<2xf32>
    %47 = vector.shape_cast %46 : vector<2xf32> to vector<2x1xf32>
    %cst_28 = arith.constant dense<0xFF800000> : vector<2xf32>
    %48 = vector.multi_reduction <maximumf>, %45, %cst_28 [1] : vector<2x4xf32> to vector<2xf32>
    %49 = vector.shape_cast %48 : vector<2xf32> to vector<2x1xf32>
    %50 = arith.maximumf %47, %49 : vector<2x1xf32>
    %51 = vector.broadcast %50 : vector<2x1xf32> to vector<2x4xf32>
    %52 = arith.subf %40, %51 : vector<2x4xf32>
    %53 = math.exp %52 : vector<2x4xf32>
    %54 = vector.broadcast %50 : vector<2x1xf32> to vector<2x4xf32>
    %55 = arith.subf %45, %54 : vector<2x4xf32>
    %56 = math.exp %55 : vector<2x4xf32>
    %cst_29 = arith.constant dense<0.000000e+00> : vector<2xf32>
    %57 = vector.multi_reduction <add>, %53, %cst_29 [1] : vector<2x4xf32> to vector<2xf32>
    %58 = vector.shape_cast %57 : vector<2xf32> to vector<2x1xf32>
    %cst_30 = arith.constant dense<0.000000e+00> : vector<2xf32>
    %59 = vector.multi_reduction <add>, %56, %cst_30 [1] : vector<2x4xf32> to vector<2xf32>
    %60 = vector.shape_cast %59 : vector<2xf32> to vector<2x1xf32>
    %61 = arith.addf %58, %60 : vector<2x1xf32>
    %62 = tpu.reciprocal %61 {approx = true} : vector<2x1xf32> -> vector<2x1xf32>
    %63 = vector.broadcast %62 : vector<2x1xf32> to vector<2x4xf32>
    %64 = arith.mulf %53, %63 : vector<2x4xf32>
    %cst_31 = arith.constant 0.000000e+00 : f32
    %65 = vector.broadcast %cst_31 : f32 to vector<2x4xf32>
    %66 = arith.subf %65, %64 : vector<2x4xf32>
    %67 = math.exp %66 : vector<2x4xf32>
    %cst_32 = arith.constant 1.000000e+00 : f32
    %68 = vector.broadcast %cst_32 : f32 to vector<2x4xf32>
    %69 = arith.addf %68, %67 : vector<2x4xf32>
    %cst_33 = arith.constant 1.000000e+00 : f32
    %70 = vector.broadcast %cst_33 : f32 to vector<2x4xf32>
    %71 = arith.divf %70, %69 : vector<2x4xf32>
    %72 = vector.broadcast %62 : vector<2x1xf32> to vector<2x4xf32>
    %73 = arith.mulf %56, %72 : vector<2x4xf32>
    %cst_34 = arith.constant 0.000000e+00 : f32
    %74 = vector.broadcast %cst_34 : f32 to vector<2x4xf32>
    %75 = arith.subf %74, %73 : vector<2x4xf32>
    %76 = math.exp %75 : vector<2x4xf32>
    %cst_35 = arith.constant 1.000000e+00 : f32
    %77 = vector.broadcast %cst_35 : f32 to vector<2x4xf32>
    %78 = arith.addf %77, %76 : vector<2x4xf32>
    %cst_36 = arith.constant 1.000000e+00 : f32
    %79 = vector.broadcast %cst_36 : f32 to vector<2x4xf32>
    %80 = arith.divf %79, %78 : vector<2x4xf32>
    %81 = arith.cmpf ogt, %71, %80 : vector<2x4xf32>
    %82 = arith.cmpf olt, %71, %80 : vector<2x4xf32>
    %cst_37 = arith.constant 0.000000e+00 : f32
    %cst_38 = arith.constant 5.000000e-01 : f32
    %83 = vector.broadcast %cst_37 : f32 to vector<2x4xf32>
    %84 = vector.broadcast %cst_38 : f32 to vector<2x4xf32>
    %85 = arith.select %82, %83, %84 : vector<2x4xi1>, vector<2x4xf32>
    %cst_39 = arith.constant 1.000000e+00 : f32
    %86 = vector.broadcast %cst_39 : f32 to vector<2x4xf32>
    %87 = arith.select %81, %86, %85 : vector<2x4xi1>, vector<2x4xf32>
    %c0_40 = arith.constant 0 : index
    %c0_41 = arith.constant 0 : index
    %88 = vector.load %arg5[%c0_40, %c0_41] : memref<8x2xf32, #tpu.memory_space<vmem>>, vector<8x2xf32>
    %cst_42 = arith.constant dense<0.000000e+00> : vector<8x4xf32>
    %89 = tpu.matmul %88, %87, %cst_42 {dimension_numbers = #tpu.dot_dimension_numbers<[1], [0], [0], [1], [0, 0, 1, 1], [], []>} : vector<8x2xf32>, vector<2x4xf32>, vector<8x4xf32> -> vector<8x4xf32>
    %90 = arith.mulf %89, %11 : vector<8x4xf32>
    %cst_43 = arith.constant dense<0.000000e+00> : vector<8xf32>
    %91 = vector.multi_reduction <add>, %90, %cst_43 [1] : vector<8x4xf32> to vector<8xf32>
    %92 = vector.shape_cast %91 : vector<8xf32> to vector<8x1xf32>
    %c0_44 = arith.constant 0 : index
    %c0_45 = arith.constant 0 : index
    %93 = vector.load %arg1[%c0_44, %c0_45] : memref<8x256xf32, #tpu.memory_space<vmem>>, vector<8x256xf32>
    %94 = vector.broadcast %92 : vector<8x1xf32> to vector<8x256xf32>
    %95 = arith.mulf %94, %93 : vector<8x256xf32>
    %cst_46 = arith.constant 1.000000e+00 : f32
    %96 = vector.broadcast %cst_46 : f32 to vector<8x1xf32>
    %97 = arith.subf %96, %92 : vector<8x1xf32>
    %c0_47 = arith.constant 0 : index
    %c0_48 = arith.constant 0 : index
    %98 = vector.load %arg2[%c0_47, %c0_48] : memref<8x256xf32, #tpu.memory_space<vmem>>, vector<8x256xf32>
    %99 = vector.broadcast %97 : vector<8x1xf32> to vector<8x256xf32>
    %100 = arith.mulf %99, %98 : vector<8x256xf32>
    %101 = arith.addf %95, %100 : vector<8x256xf32>
    %c0_49 = arith.constant 0 : index
    %c0_50 = arith.constant 0 : index
    %102 = vector.load %arg7[%c0_49, %c0_50] : memref<8x256xf32, #tpu.memory_space<vmem>>, vector<8x256xf32>
    tpu.vector_store %arg7[%c0_49, %c0_50], %101 {strides = array<i32>} : memref<8x256xf32, #tpu.memory_space<vmem>>, vector<8x256xf32>,
    return
  }
  func.func @transform_0(%arg0: i32) -> (i32, i32) {
    %c0_i32 = arith.constant 0 : i32
    %c0_i32_0 = arith.constant 0 : i32
    return %arg0, %c0_i32 : i32, i32
  }
  func.func @transform_1(%arg0: i32) -> (i32, i32) {
    %c0_i32 = arith.constant 0 : i32
    %c0_i32_0 = arith.constant 0 : i32
    return %arg0, %c0_i32 : i32, i32
  }
  func.func @transform_2(%arg0: i32) -> (i32, i32) {
    %c0_i32 = arith.constant 0 : i32
    %c0_i32_0 = arith.constant 0 : i32
    %c0_i32_1 = arith.constant 0 : i32
    return %c0_i32, %c0_i32_0 : i32, i32
  }
  func.func @transform_3(%arg0: i32) -> (i32, i32) {
    %c0_i32 = arith.constant 0 : i32
    %c0_i32_0 = arith.constant 0 : i32
    %c0_i32_1 = arith.constant 0 : i32
    return %c0_i32, %c0_i32_0 : i32, i32
  }
  func.func @transform_4(%arg0: i32) -> (i32, i32) {
    %c0_i32 = arith.constant 0 : i32
    %c0_i32_0 = arith.constant 0 : i32
    %c0_i32_1 = arith.constant 0 : i32
    return %c0_i32, %c0_i32_0 : i32, i32
  }
  func.func @transform_5(%arg0: i32) -> (i32, i32) {
    %c0_i32 = arith.constant 0 : i32
    %c0_i32_0 = arith.constant 0 : i32
    %c0_i32_1 = arith.constant 0 : i32
    return %c0_i32, %c0_i32_0 : i32, i32
  }
  func.func @transform_6(%arg0: i32) -> (i32, i32) {
    %c0_i32 = arith.constant 0 : i32
    %c0_i32_0 = arith.constant 0 : i32
    return %arg0, %c0_i32 : i32, i32
  }
}

</mosaic_0001>

<bundles_post_ra>
// kernel: tpu_custom_call.1
= control target key start
LH: loop header
LB: loop body
LE: loop exit
PB: predicated region body
PF: predicated region fallthrough
CT: control target
= control target key end

     0   :  { %s911_s0 = inlined_call_operand.vmem [shape: f32[8,256], index: 0, kind: input, shape index: {}]   ;;  %s912_s1 = inlined_call_operand.vmem [shape: f32[8,256], index: 1, kind: input, shape index: {}]   ;;  %s913_s2 = inlined_call_operand.vmem [shape: f32[22,4], index: 2, kind: input, shape index: {}]   ;;  %s914_s3 = inlined_call_operand.vmem [shape: f32[2,8], index: 3, kind: input, shape index: {}]   ;;  %s915_s4 = inlined_call_operand.vmem [shape: f32[8,2], index: 4, kind: input, shape index: {}]   ;;  %s916_s5 = inlined_call_operand.vmem [shape: f32[8,4], index: 5, kind: input, shape index: {}]   ;;  %s917_s6 = inlined_call_operand.hbm [shape: f32[8,256], index: 6, kind: output, shape index: {}]  }
   0x1   :  { %v819_v0 = vld [vmem:[%s911_s0] sm:$0xff]  ;;  %v824_v1 = vld [vmem:[%s911_s0 + $0x8] sm:$0xff] }
   0x2   :  { %v829_v2 = vld [vmem:[%s912_s1] sm:$0xff]  ;;  %v26_v3 = vadd.f32 %v824_v1, %v819_v0  ;;  %v836_v4 = vld [vmem:[%s912_s1 + $0x8] sm:$0xff] }
   0x3   :  { %11 = vsyncpa [#allocation3], 0  ;;  %v32_v5 = vadd.f32 %v836_v4, %v829_v2  ;;  %v777_v6 = vmov 0.0   ;;  %vm778_vm0 = vmmov 0   ;;  %v845_v8 = vld [vmem:[%s916_s5] sm:$0xff]  ;;  %vm39_vm1 = vcmask 64512  }
   0x4   :  { %27 = vadd.xlane.f32.xlu0 %v26_v3  ;;  %702 = vmatprep.subr.mxu0 %v777_v6  ;;  %v36_v11 = vld [vmem:[%s914_s3] sm:$0x3]  ;;  %vm218_vm2 = vcmask 1043456   ;;  %v211_v16 = vld [vmem:[%s913_s2 + $0x4] sm:$0xf]  ;;  %vm214_vm3 = vcmask 31744  }
   0x5   :  { %707 = vmatprep.subr.mxu1 %v777_v6  ;;  %704 = vmatprep.mubr.msk.f32.mxu0 %vm778_vm0, %v777_v6  ;;  %v210_v15 = vld [vmem:[%s913_s2] sm:$0xf]  ;;  %v672_v17 = vld [vmem:[%s913_s2 + $0x10] ss:$0 sm:$0xff]  ;;  %v673_v19 = vld [vmem:[%s913_s2 + $0x12] ss:$0 sm:$0xff] }
   0x6   :  { %709 = vmatprep.mubr.msk.f32.mxu1 %vm778_vm0, %v777_v6  ;;  %v674_v22 = vld [vmem:[%s913_s2 + $0x11] ss:$0 sm:$0xff]  ;;  %v212_v24 = vld [vmem:[%s913_s2 + $0x8] sm:$0xf]  ;;  %v675_v26 = vld [vmem:[%s913_s2 + $0x13] ss:$0 sm:$0xff] }
   0x7   :  { %v213_v30 = vld [vmem:[%s913_s2 + $0xc] sm:$0xf]  ;;  %v680_v35 = vld [vmem:[%s913_s2 + $0x14] ss:$0 sm:$0xff]  ;;  %vm524_vm4 = vcmask 25600   ;;  %vm569_vm7 = vcmask 1041408  }
   0x8   :  { %33 = vadd.xlane.f32.xlu0 %v32_v5  ;;  %v685_v41 = vld [vmem:[%s913_s2 + $0x15] ss:$0 sm:$0xff]  ;;  %vm565_vm8 = vcmask 15360   ;;  %s780_s26 = smov [#allocation2]  }
   0x9   :  { %s662_s27 = sshll.u32 %s780_s26, 4  ;;  %s663_s27 = int_to_ptr.vmem [resolvable:$true] %s662_s27 }
   0xa   :  { %p760_p1 = scmp.lt.s32.totalorder %s663_s27, %s663_s27 }
  0x8d   :  { %v28_v7 = vpop.xlane.xlu0 %27 }
  0x8e   :  { %v29_v9 = vmul.f32 0.00390625, %v28_v7 }
  0x90   :  { %v38_v10 = vmul.f32 %v845_v8, %v29_v9 }
  0x91   :  { %v34_v12 = vpop.xlane.xlu0 %33 }
  0x92   :  { %v35_v13 = vmul.f32 0.00390625, %v34_v12  ;;  %703 = vmatpush3.msra.mxu0 %v38_v10 }
  0x93   :  { %705 = vmatmul.mubr.msk.f32.vlgmr.msra.gmra.mxu0 %vm39_vm1, %v36_v11  ;;  %712 = vmatprep.subr.mxu0 %v777_v6 }
  0x94   :  { %v113_v14 = vmul.f32 %v845_v8, %v35_v13  ;;  %714 = vmatprep.mubr.msk.f32.mxu0 %vm778_vm0, %v777_v6  ;;  %713 = vmatpush3.msk.msra.mxu0 %vm218_vm2, %v211_v16 }
  0x95   :  { %722 = vmatprep.subr.mxu0 %v777_v6 }
  0x96   :  { %708 = vmatpush3.msra.mxu1 %v113_v14 }
  0x97   :  { %710 = vmatmul.mubr.msk.f32.vlgmr.msra.gmra.mxu1 %vm39_vm1, %v36_v11  ;;  %717 = vmatprep.subr.mxu1 %v777_v6 }
  0x98   :  { %719 = vmatprep.mubr.msk.f32.mxu1 %vm778_vm0, %v777_v6  ;;  %718 = vmatpush3.msk.msra.mxu1 %vm218_vm2, %v210_v15  ;;  %v779_v15 = vmov 0.5  }
  0x99   :  { %727 = vmatprep.subr.mxu1 %v777_v6 }
 0x153   :  { %v109_v18 = vpop.f32.mrf.mxu0 }
 0x154   :  { %v194_v20 = vmul.f32 %v672_v17, %v109_v18  ;;  %v564_v17 = vld [vmem:[%s915_s4] sm:$0xff]  ;;  %s755_s4 = scalar_lea.vmem %s663_s27, 256 }
 0x155   :  { %v706_v21 = vpop.f32.mrf.mxu0  ;;  %p756_p0 = scmp.ne.s32.totalorder %s663_s27, %s755_s4  ;;  %p761_p2 = scmp.lt.s32.totalorder %s755_s4, %s755_s4 }
 0x156   :  { %v199_v23 = vadd.f32 %v673_v19, %v194_v20 }
 0x157   :  { %v180_v25 = vpop.f32.mrf.mxu1  ;;  %p762_p3 = por %p761_p2, %p760_p1 }
 0x158   :  { %v204_v27 = vmul.f32 %v674_v22, %v180_v25  ;;  %720 = vmatmul.mubr.msk.f32.vlgmr.msra.gmra.mxu1 %vm214_vm3, %v199_v23 }
 0x159   :  { %v711_v28 = vpop.f32.mrf.mxu1  ;;  %728 = vmatpush3.msk.msra.mxu1 %vm218_vm2, %v212_v24  ;;  %729 = vmatprep.mubr.msk.f32.mxu1 %vm778_vm0, %v777_v6  ;;  %p763_p4 = pnand %p762_p3, %p756_p0 }
 0x15a   :  { %v209_v29 = vadd.f32 %v675_v26, %v204_v27 }
 0x15c   :  { %715 = vmatmul.mubr.msk.f32.vlgmr.msra.gmra.mxu0 %vm214_vm3, %v209_v29  ;;  %730 = vmatmul.mubr.msk.f32.vlgmr.msra.gmra.mxu1 %vm214_vm3, %v199_v23 }
 0x15d   :  { %723 = vmatpush3.msk.msra.mxu0 %vm218_vm2, %v213_v30  ;;  %724 = vmatprep.mubr.msk.f32.mxu0 %vm778_vm0, %v777_v6 }
 0x15e   :  { %732 = vmatprep.subr.mxu0 %v777_v6 }
 0x160   :  { %725 = vmatmul.mubr.msk.f32.vlgmr.msra.gmra.mxu0 %vm214_vm3, %v209_v29 }
 0x161   :  { %734 = vmatprep.mubr.msk.f32.mxu0 %vm778_vm0, %v777_v6 }
 0x218   :  { %v364_v31 = vpop.f32.mrf.mxu1 }
 0x21a   :  { %v721_v32 = vpop.f32.mrf.mxu1 }
 0x21c   :  { %v288_v33 = vpop.f32.mrf.mxu0  ;;  %v515_v34 = vpop.f32.mrf.mxu1 }
 0x21d   :  { %v365_v36 = vadd.f32 %v364_v31, %v288_v33 }
 0x21e   :  { %v716_v37 = vpop.f32.mrf.mxu0  ;;  %v731_v38 = vpop.f32.mrf.mxu1 }
 0x21f   :  { %v372_v39 = vadd.f32 %v680_v35, %v365_v36 }
 0x220   :  { %v442_v40 = vpop.f32.mrf.mxu0 }
 0x221   :  { %v516_v42 = vadd.f32 %v515_v34, %v442_v40  ;;  %v525_v43 = vsel %vm524_vm4, %v372_v39, -inf }
 0x222   :  { %v726_v44 = vpop.f32.mrf.mxu0  ;;  %526 = vmax.xlane.f32.xlu1 %v525_v43 }
 0x223   :  { %v523_v45 = vadd.f32 %v685_v41, %v516_v42 }
 0x225   :  { %v528_v46 = vsel %vm524_vm4, %v523_v45, -inf }
 0x226   :  { %529 = vmax.xlane.f32.xlu1 %v528_v46 }
 0x2ab   :  { %v527_v47 = vpop.xlane.xlu1 %526 }
 0x2af   :  { %v530_v48 = vpop.xlane.xlu1 %529 }
 0x2b0   :  { %v531_v49 = vmax.f32 %v527_v47, %v530_v48 }
 0x2b2   :  { %v532_v50 = vsub.f32 %v372_v39, %v531_v49  ;;  %v535_v51 = vsub.f32 %v523_v45, %v531_v49 }
 0x2b4   :  { %v533_v52 = vmul.f32 1.442695, %v532_v50  ;;  %v536_v53 = vmul.f32 1.442695, %v535_v51 }
 0x2b6   :  { %741 = vpow2.f32 %v533_v52 }
 0x2b7   :  { %743 = vpow2.f32 %v536_v53 }
 0x2c3   :  { %v742_v54 = vpop.eup %741 }
 0x2c4   :  { %v744_v55 = vpop.eup %743  ;;  %v538_v56 = vsel %vm524_vm4, %v742_v54, 0.0 }
 0x2c5   :  { %v541_v57 = vsel %vm524_vm4, %v744_v55, 0.0  ;;  %539 = vadd.xlane.f32.xlu0 %v538_v56 }
 0x2c6   :  { %542 = vadd.xlane.f32.xlu1 %v541_v57 }
 0x34e   :  { %v540_v58 = vpop.xlane.xlu0 %539 }
 0x34f   :  { %v543_v59 = vpop.xlane.xlu1 %542 }
 0x350   :  { %v544_v60 = vadd.f32 %v543_v59, %v540_v58 }
 0x352   :  { %745 = vrcp.f32 %v544_v60 }
 0x35f   :  { %v746_v61 = vpop.eup %745 }
 0x360   :  { %v546_v62 = vmul.f32 %v746_v61, %v742_v54  ;;  %v553_v63 = vmul.f32 %v746_v61, %v744_v55 }
 0x362   :  { %v547_v3 = vsub.f32 0.0, %v546_v62  ;;  %v554_v5 = vsub.f32 0.0, %v553_v63 }
 0x364   :  { %v548_v6 = vmul.f32 1.442695, %v547_v3  ;;  %v555_v7 = vmul.f32 1.442695, %v554_v5 }
 0x366   :  { %747 = vpow2.f32 %v548_v6 }
 0x367   :  { %749 = vpow2.f32 %v555_v7 }
 0x373   :  { %v748_v9 = vpop.eup %747 }
 0x374   :  { %v750_v10 = vpop.eup %749  ;;  %v550_v11 = vadd.f32 1.0, %v748_v9 }
 0x375   :  { %v557_v12 = vadd.f32 1.0, %v750_v10 }
 0x376   :  { %751 = vrcp.f32 %v550_v11 }
 0x377   :  { %753 = vrcp.f32 %v557_v12 }
 0x383   :  { %v752_v13 = vpop.eup %751 }
 0x384   :  { %v754_v14 = vpop.eup %753 }
 0x385   :  { %vm560_vm5 = vcmp.gt.f32.partialorder %v752_v13, %v754_v14  ;;  %vm561_vm6 = vcmp.lt.f32.partialorder %v752_v13, %v754_v14 }
 0x386   :  { %v562_v16 = vsel %vm561_vm6, 0.0, %v779_v15 }
 0x387   :  { %v563_v18 = vsel %vm560_vm5, 1.0, %v562_v16 }
 0x388   :  { %733 = vmatpush3.msk.msra.mxu0 %vm569_vm7, %v563_v18 }
 0x389   :  { %735 = vmatmul.mubr.msk.f32.vlgmr.msra.gmra.mxu0 %vm565_vm8, %v564_v17 }
 0x449   :  { %v639_v19 = vpop.f32.mrf.mxu0 }
 0x44a   :  { %v643_v20 = vmul.f32 %v639_v19, %v845_v8 }
 0x44b   :  { %v736_v21 = vpop.f32.mrf.mxu0 }
 0x44c   :  { %v644_v22 = vsel %vm214_vm3, %v643_v20, 0.0 }
 0x44d   :  { %645 = vadd.xlane.f32.xlu0 %v644_v22 }
 0x4d6   :  { %v646_v23 = vpop.xlane.xlu0 %645 }
 0x4d7   :  { %v649_v24 = vsub.f32 1.0, %v646_v23  ;;  %v647_v25 = vmul.f32 %v646_v23, %v819_v0  ;;  %v648_v26 = vmul.f32 %v646_v23, %v824_v1 }
 0x4d9   :  { %v650_v27 = vmul.f32 %v649_v24, %v829_v2  ;;  %v651_v28 = vmul.f32 %v649_v24, %v836_v4 }
 0x4db   :  { %v652_v29 = vadd.f32 %v650_v27, %v647_v25  ;;  %v653_v30 = vadd.f32 %v651_v28, %v648_v26 }
 0x4dd   :  { %654 = vst [vmem:[#allocation2] sm:$0xff] %v652_v29  ;;  %655 = vst [vmem:[#allocation2 + $0x8] sm:$0xff] %v653_v30 }
 0x4de   :  { %766 = shalt.err (!%p763_p4)
}
 0x4df   :  { %665 = dma.vmem_to_hbm [thread:$0]  %s663_s27, 256, %s917_s6, [#allocation3]  }
 0x4e0   :  { %775 = dma.done.wait [#allocation3], 256  }
 0x4e1   :  { %776 = vsyncadd [#allocation3], 4294967040 }
 0x4e2   :  { %669 = vsyncpa [#allocation3], 1 }

</bundles_post_ra>
